<compile_context>
chip_gen: v7x
topology: tpu7x:2x2x1
jax: 0.10.0
libtpu: 0.0.40
codegen_flags: <defaults>
</compile_context>

<pallas_src>
import math

import jax
import jax.numpy as jnp
from jax.experimental import pallas as pl
from jax.experimental.pallas import tpu as pltpu

LN_EPS = 1e-5          # nn.LayerNorm default eps
DROPOUT_RATE = 0.01    # nn.Dropout(p) -- identity in eval mode


# --------------------------------------------------------------------------- #
# Kernels
# --------------------------------------------------------------------------- #
def _layernorm_f32(xf, gamma, beta):
    # Single pass over xf: mean and mean-of-squares together (one fewer (tm,D)
    # f32 temporary than the mean/centered/var sequence).
    mean = jnp.mean(xf, axis=-1, keepdims=True)
    mean_sq = jnp.mean(xf * xf, axis=-1, keepdims=True)
    var = mean_sq - mean * mean
    inv = jax.lax.rsqrt(var + LN_EPS)
    return (xf - mean) * inv * gamma + beta


def _kernel_resident(x_ref, gamma_ref, beta_ref, w_ref, b_ref, o_ref):
    """Resident-weight path: x (tm, D), weight (D, D) bf16 held in VMEM."""
    xf = x_ref[...].astype(jnp.float32)                       # f32 stats on VPU
    ln = _layernorm_f32(xf, gamma_ref[...], beta_ref[...])
    # Linear(D, D): bf16 x bf16 on the MXU, f32 accumulate.
    y = jnp.dot(ln.astype(jnp.bfloat16), w_ref[...],
                preferred_element_type=jnp.float32) + b_ref[...]
    # TODO(synk): training-mode dropout would use pltpu.prng_seed +
    # pltpu.stateful_bernoulli; eval-mode forward is the identity map.
    o_ref[...] = (xf + y).astype(o_ref.dtype)


def _kernel_coltiled(x_ref, xr_ref, gamma_ref, beta_ref, w_ref, b_ref,
                     o_ref, ln_ref):
    """Column-tiled path: grid (row_blocks, col_blocks).

    x_ref   : (tm, D)   full rows (fetched once per row block, index (i, 0))
    xr_ref  : (tm, tn)  residual column slab (index (i, j))
    w_ref   : (D, tn)   weight column block
    b_ref   : (1, tn)
    o_ref   : (tm, tn)
    ln_ref  : (tm, D)   bf16 VMEM scratch, LayerNorm cached across j
    """
    j = pl.program_id(1)

    @pl.when(j == 0)
    def _():
        xf = x_ref[...].astype(jnp.float32)
        ln = _layernorm_f32(xf, gamma_ref[...], beta_ref[...])
        ln_ref[...] = ln.astype(jnp.bfloat16)

    y = jnp.dot(ln_ref[...], w_ref[...],
                preferred_element_type=jnp.float32) + b_ref[...]
    o_ref[...] = (xr_ref[...].astype(jnp.float32) + y).astype(o_ref.dtype)


# --------------------------------------------------------------------------- #
# Wrapper
# --------------------------------------------------------------------------- #
def _vmem_capacity_bytes():
    """Per-core VMEM capacity; conservative 64 MiB fallback (v7x-safe)."""
    try:
        info = pltpu.get_tpu_info()
        cap = getattr(info, "vmem_capacity_bytes", None)
        if cap:
            return int(cap)
    except Exception:
        pass
    return 64 << 20


def _const_spec(shape, index_map):
    """Single-buffered BlockSpec for operands whose block index never changes."""
    if hasattr(pl, "Buffered"):
        return pl.BlockSpec(shape, index_map, pipeline_mode=pl.Buffered(1))
    return pl.BlockSpec(shape, index_map)


def prenorm_res(x, gamma, beta, w, b, *, max_weight_block_bytes=None):
    """PreNormRes forward: x + Linear(LayerNorm(x))  (dropout = eval identity).

    x: (..., D), f32 or bf16 (output dtype == input dtype).
    """
    orig_shape = x.shape
    D = orig_shape[-1]
    rows = math.prod(orig_shape[:-1])
    x2 = x.reshape(rows, D)

    xbytes = jnp.dtype(x.dtype).itemsize          # x/out I/O width (bf16 or f32)
    gamma2 = gamma.reshape(1, D).astype(jnp.float32)
    beta2 = beta.reshape(1, D).astype(jnp.float32)
    b2 = b.reshape(1, D).astype(jnp.float32)
    # TODO(synk): on v5e/v6e an int8-weight path (MXU-native there, not on v7x)
    # would further cut weight DMA; bf16 is the portable choice.
    w_bf16 = w.astype(jnp.bfloat16)

    cap = _vmem_capacity_bytes()
    budget = int(cap * 0.72)                      # headroom for Mosaic scratch etc.
    if max_weight_block_bytes is None:
        max_weight_block_bytes = budget // 2
    target_tile_bytes = 8 << 20                   # per x-tile byte target

    def round_tm(t):
        t = int(max(8, min(t, rows)))
        if t >= rows:
            return rows                           # full row extent is always legal
        return max(8, (t // 8) * 8)               # else keep a multiple of 8 sublanes

    # ---- choose path -------------------------------------------------------
    can_col_tile = (D % 128 == 0) and (D >= 256)
    # Resident-path footprint: single-buffered bf16 weight + small params
    # + per-row: x & out double-buffered at I/O width, plus f32 xf, bf16 ln,
    # f32 y temporaries (~12 B/elem).
    fixed_a = D * D * 2 + 6 * D * 4
    per_row_a = D * (2 * xbytes + 2 * xbytes + 12)
    resident_fits = fixed_a + 8 * per_row_a <= budget
    use_resident = (not can_col_tile) or \
                   (resident_fits and D * D * 2 <= max_weight_block_bytes)

    if use_resident:
        tm = round_tm(min(
            (budget - fixed_a) // per_row_a if budget > fixed_a else 8,
            max(1, target_tile_bytes // max(1, D * xbytes)),
            2048))
        needed = fixed_a + tm * per_row_a
        vmem_limit = int(min(cap, max(needed * 3 // 2, 32 << 20)))

        # TODO(synk): D < 128 (the toy self-test) forces masked partial stores;
        # realistic D (multiple of 128) is lane-dense already.
        out = pl.pallas_call(
            _kernel_resident,
            out_shape=jax.ShapeDtypeStruct((rows, D), x.dtype),
            grid_spec=pltpu.PrefetchScalarGridSpec(
                num_scalar_prefetch=0,
                grid=(pl.cdiv(rows, tm),),        # ragged last block: no pad needed
                in_specs=[
                    pl.BlockSpec((tm, D), lambda i: (i, 0)),
                    _const_spec((1, D), lambda i: (0, 0)),   # gamma
                    _const_spec((1, D), lambda i: (0, 0)),   # beta
                    _const_spec((D, D), lambda i: (0, 0)),   # weight (resident)
                    _const_spec((1, D), lambda i: (0, 0)),   # bias
                ],
                out_specs=pl.BlockSpec((tm, D), lambda i: (i, 0)),
            ),
            compiler_params=pltpu.CompilerParams(
                dimension_semantics=("parallel",),
                vmem_limit_bytes=vmem_limit,
            ),
        )(x2, gamma2, beta2, w_bf16, b2)

    else:
        # Column-tiled path (large D / v7x fit): weight streamed in (D, tn) blocks.
        tn = 128
        for cand in (1024, 512, 256):
            if D % cand == 0 and 2 * 2 * D * cand <= max_weight_block_bytes:
                tn = cand
                break
        fixed_b = 2 * D * tn * 2 + 2 * D * 4 * 2 + 2 * tn * 4 * 2
        per_row_b = (2 * D * xbytes      # x full rows, double-buffered
                     + 2 * tn * xbytes   # x column slab, double-buffered
                     + 2 * tn * xbytes   # out tile, double-buffered
                     + D * 2             # bf16 LayerNorm scratch (resident)
                     + D * 8 + tn * 8)   # f32 temporaries (xf/ln at j==0, y)
        tm = round_tm(min(
            (budget - fixed_b) // per_row_b if budget > fixed_b else 8,
            max(1, target_tile_bytes // max(1, D * xbytes)),
            1024))
        needed = fixed_b + tm * per_row_b
        vmem_limit = int(min(cap, max(needed * 3 // 2, 32 << 20)))

        out = pl.pallas_call(
            _kernel_coltiled,
            out_shape=jax.ShapeDtypeStruct((rows, D), x.dtype),
            grid_spec=pltpu.PrefetchScalarGridSpec(
                num_scalar_prefetch=0,
                grid=(pl.cdiv(rows, tm), D // tn),
                in_specs=[
                    pl.BlockSpec((tm, D), lambda i, j: (i, 0)),    # x rows (LN input)
                    pl.BlockSpec((tm, tn), lambda i, j: (i, j)),   # x residual slab
                    _const_spec((1, D), lambda i, j: (0, 0)),      # gamma
                    _const_spec((1, D), lambda i, j: (0, 0)),      # beta
                    pl.BlockSpec((D, tn), lambda i, j: (0, j)),    # weight cols (dbl-buf)
                    pl.BlockSpec((1, tn), lambda i, j: (0, j)),    # bias cols
                ],
                out_specs=pl.BlockSpec((tm, tn), lambda i, j: (i, j)),
                scratch_shapes=[pltpu.VMEM((tm, D), jnp.bfloat16)],
            ),
            compiler_params=pltpu.CompilerParams(
                dimension_semantics=("parallel", "arbitrary"),
                vmem_limit_bytes=vmem_limit,
            ),
        )(x2, x2, gamma2, beta2, w_bf16, b2)

    return out.reshape(orig_shape)


# --------------------------------------------------------------------------- #
# Reference + self-test
# --------------------------------------------------------------------------- #
def reference(x, gamma, beta, w, b):
    mean = jnp.mean(x, axis=-1, keepdims=True)
    var = jnp.mean((x - mean) ** 2, axis=-1, keepdims=True)
    ln = (x - mean) / jnp.sqrt(var + LN_EPS) * gamma + beta
    return x + ln @ w + b     # dropout is identity in eval mode


if __name__ == "__main__":
    key = jax.random.PRNGKey(0)
    k1, k2, k3, k4, k5, k6, k7 = jax.random.split(key, 7)

    # --- Test 1: module-sized toy shape, resident-weight path --------------
    B, S, D = 2, 8, 32
    x = jax.random.normal(k1, (B, S, D), dtype=jnp.float32)
    gamma = jnp.ones((D,), jnp.float32)          # nn.LayerNorm init
    beta = jnp.zeros((D,), jnp.float32)
    w = jax.random.normal(k2, (D, D), dtype=jnp.float32) * (1.0 / jnp.sqrt(D))
    b = jnp.zeros((D,), jnp.float32)

    out = jax.block_until_ready(prenorm_res(x, gamma, beta, w, b))
    ref = reference(x, gamma, beta, w, b)
    assert out.shape == x.shape and out.dtype == x.dtype
    # bf16 MXU matmul (f32 accumulate) => tolerance loosened vs pure-f32.
    assert jnp.allclose(out, ref, atol=5e-2, rtol=5e-2), "resident path mismatch"

    # --- Test 2: exercise the column-tiled (large-D / v7x-fit) path --------
    D2 = 256
    x_c = jax.random.normal(k3, (B, S, D2), dtype=jnp.float32)
    gamma_c = 1.0 + 0.1 * jax.random.normal(k4, (D2,), dtype=jnp.float32)
    beta_c = 0.1 * jax.random.normal(k5, (D2,), dtype=jnp.float32)
    w_c = jax.random.normal(k6, (D2, D2), dtype=jnp.float32) * (1.0 / jnp.sqrt(D2))
    b_c = 0.1 * jax.random.normal(k7, (D2,), dtype=jnp.float32)

    out_c = jax.block_until_ready(
        prenorm_res(x_c, gamma_c, beta_c, w_c, b_c,
                    max_weight_block_bytes=100_000))   # force column tiling
    ref_c = reference(x_c, gamma_c, beta_c, w_c, b_c)
    assert out_c.shape == x_c.shape
    assert jnp.allclose(out_c, ref_c, atol=5e-2, rtol=5e-2), "col-tiled path mismatch"

    print("KERNEL_OK")
</pallas_src>

<mosaic_0001>
module attributes {stable_mosaic.version = 11 : i64} {
  func.func @_kernel_resident(%arg0: i32, %arg1: memref<16x32xf32, #tpu.memory_space<vmem>>, %arg2: memref<1x32xf32, #tpu.memory_space<vmem>>, %arg3: memref<1x32xf32, #tpu.memory_space<vmem>>, %arg4: memref<32x32xbf16, #tpu.memory_space<vmem>>, %arg5: memref<1x32xf32, #tpu.memory_space<vmem>>, %arg6: memref<16x32xf32, #tpu.memory_space<vmem>>) attributes {dimension_semantics = [#tpu.dimension_semantics<parallel>], iteration_bounds = array<i64: 1>, scalar_prefetch = 0 : i64, scratch_operands = 0 : i64, tpu.core_type = #tpu.core_type<tc>, window_params = [{transform_indices = @transform_0, window_bounds = array<i64: 16, 32>}, {pipeline_mode = #tpu.pipeline_mode<synchronous>, transform_indices = @transform_1, window_bounds = array<i64: 1, 32>}, {pipeline_mode = #tpu.pipeline_mode<synchronous>, transform_indices = @transform_2, window_bounds = array<i64: 1, 32>}, {pipeline_mode = #tpu.pipeline_mode<synchronous>, transform_indices = @transform_3, window_bounds = array<i64: 32, 32>}, {pipeline_mode = #tpu.pipeline_mode<synchronous>, transform_indices = @transform_4, window_bounds = array<i64: 1, 32>}, {transform_indices = @transform_5, window_bounds = array<i64: 16, 32>}]} {
    %c0 = arith.constant 0 : index
    %c0_0 = arith.constant 0 : index
    %0 = vector.load %arg1[%c0, %c0_0] : memref<16x32xf32, #tpu.memory_space<vmem>>, vector<16x32xf32>
    %c0_1 = arith.constant 0 : index
    %c0_2 = arith.constant 0 : index
    %1 = vector.load %arg2[%c0_1, %c0_2] : memref<1x32xf32, #tpu.memory_space<vmem>>, vector<1x32xf32>
    %c0_3 = arith.constant 0 : index
    %c0_4 = arith.constant 0 : index
    %2 = vector.load %arg3[%c0_3, %c0_4] : memref<1x32xf32, #tpu.memory_space<vmem>>, vector<1x32xf32>
    %cst = arith.constant dense<0.000000e+00> : vector<16xf32>
    %3 = vector.multi_reduction <add>, %0, %cst [1] : vector<16x32xf32> to vector<16xf32>
    %4 = vector.shape_cast %3 : vector<16xf32> to vector<16x1xf32>
    %cst_5 = arith.constant 3.200000e+01 : f32
    %5 = vector.broadcast %cst_5 : f32 to vector<16x1xf32>
    %6 = arith.divf %4, %5 : vector<16x1xf32>
    %7 = arith.mulf %0, %0 : vector<16x32xf32>
    %cst_6 = arith.constant dense<0.000000e+00> : vector<16xf32>
    %8 = vector.multi_reduction <add>, %7, %cst_6 [1] : vector<16x32xf32> to vector<16xf32>
    %9 = vector.shape_cast %8 : vector<16xf32> to vector<16x1xf32>
    %cst_7 = arith.constant 3.200000e+01 : f32
    %10 = vector.broadcast %cst_7 : f32 to vector<16x1xf32>
    %11 = arith.divf %9, %10 : vector<16x1xf32>
    %12 = arith.mulf %6, %6 : vector<16x1xf32>
    %13 = arith.subf %11, %12 : vector<16x1xf32>
    %cst_8 = arith.constant 9.99999974E-6 : f32
    %14 = vector.broadcast %cst_8 : f32 to vector<16x1xf32>
    %15 = arith.addf %13, %14 : vector<16x1xf32>
    %16 = math.rsqrt %15 : vector<16x1xf32>
    %17 = vector.broadcast %6 : vector<16x1xf32> to vector<16x32xf32>
    %18 = arith.subf %0, %17 : vector<16x32xf32>
    %19 = vector.broadcast %16 : vector<16x1xf32> to vector<16x32xf32>
    %20 = arith.mulf %18, %19 : vector<16x32xf32>
    %21 = vector.broadcast %1 : vector<1x32xf32> to vector<16x32xf32>
    %22 = arith.mulf %20, %21 : vector<16x32xf32>
    %23 = vector.broadcast %2 : vector<1x32xf32> to vector<16x32xf32>
    %24 = arith.addf %22, %23 : vector<16x32xf32>
    %25 = arith.truncf %24 : vector<16x32xf32> to vector<16x32xbf16>
    %c0_9 = arith.constant 0 : index
    %c0_10 = arith.constant 0 : index
    %26 = vector.load %arg4[%c0_9, %c0_10] : memref<32x32xbf16, #tpu.memory_space<vmem>>, vector<32x32xbf16>
    %cst_11 = arith.constant dense<0.000000e+00> : vector<16x32xf32>
    %27 = tpu.matmul %25, %26, %cst_11 {dimension_numbers = #tpu.dot_dimension_numbers<[1], [0], [0], [1], [0, 0, 1, 1], [], []>} : vector<16x32xbf16>, vector<32x32xbf16>, vector<16x32xf32> -> vector<16x32xf32>
    %c0_12 = arith.constant 0 : index
    %c0_13 = arith.constant 0 : index
    %28 = vector.load %arg5[%c0_12, %c0_13] : memref<1x32xf32, #tpu.memory_space<vmem>>, vector<1x32xf32>
    %29 = vector.broadcast %28 : vector<1x32xf32> to vector<16x32xf32>
    %30 = arith.addf %27, %29 : vector<16x32xf32>
    %31 = arith.addf %0, %30 : vector<16x32xf32>
    %c0_14 = arith.constant 0 : index
    %c0_15 = arith.constant 0 : index
    %32 = vector.load %arg6[%c0_14, %c0_15] : memref<16x32xf32, #tpu.memory_space<vmem>>, vector<16x32xf32>
    tpu.vector_store %arg6[%c0_14, %c0_15], %31 {strides = array<i32>} : memref<16x32xf32, #tpu.memory_space<vmem>>, vector<16x32xf32>,
    return
  }
  func.func @transform_0(%arg0: i32) -> (i32, i32) {
    %c0_i32 = arith.constant 0 : i32
    %c0_i32_0 = arith.constant 0 : i32
    return %arg0, %c0_i32 : i32, i32
  }
  func.func @transform_1(%arg0: i32) -> (i32, i32) {
    %c0_i32 = arith.constant 0 : i32
    %c0_i32_0 = arith.constant 0 : i32
    %c0_i32_1 = arith.constant 0 : i32
    return %c0_i32, %c0_i32_0 : i32, i32
  }
  func.func @transform_2(%arg0: i32) -> (i32, i32) {
    %c0_i32 = arith.constant 0 : i32
    %c0_i32_0 = arith.constant 0 : i32
    %c0_i32_1 = arith.constant 0 : i32
    return %c0_i32, %c0_i32_0 : i32, i32
  }
  func.func @transform_3(%arg0: i32) -> (i32, i32) {
    %c0_i32 = arith.constant 0 : i32
    %c0_i32_0 = arith.constant 0 : i32
    %c0_i32_1 = arith.constant 0 : i32
    return %c0_i32, %c0_i32_0 : i32, i32
  }
  func.func @transform_4(%arg0: i32) -> (i32, i32) {
    %c0_i32 = arith.constant 0 : i32
    %c0_i32_0 = arith.constant 0 : i32
    %c0_i32_1 = arith.constant 0 : i32
    return %c0_i32, %c0_i32_0 : i32, i32
  }
  func.func @transform_5(%arg0: i32) -> (i32, i32) {
    %c0_i32 = arith.constant 0 : i32
    %c0_i32_0 = arith.constant 0 : i32
    return %arg0, %c0_i32 : i32, i32
  }
}

</mosaic_0001>

<bundles_post_ra>
// kernel: tpu_custom_call.1
= control target key start
LH: loop header
LB: loop body
LE: loop exit
PB: predicated region body
PF: predicated region fallthrough
CT: control target
= control target key end

     0   :  { %10 = vsyncpa [#allocation3], 0  ;;  %s393_s0 = inlined_call_operand.hbm [shape: f32[16,32], index: 0, kind: input, shape index: {}]   ;;  %s394_s1 = inlined_call_operand.vmem [shape: f32[1,32], index: 1, kind: input, shape index: {}]   ;;  %s395_s2 = inlined_call_operand.vmem [shape: f32[1,32], index: 2, kind: input, shape index: {}]   ;;  %s396_s3 = inlined_call_operand.hbm [shape: bf16[32,32], index: 3, kind: input, shape index: {}]   ;;  %s397_s4 = inlined_call_operand.vmem [shape: f32[1,32], index: 4, kind: input, shape index: {}]   ;;  %s398_s5 = inlined_call_operand.hbm [shape: f32[16,32], index: 5, kind: output, shape index: {}]  }
   0x1   :  { %11 = vsyncpa [#allocation6], 0 }
   0x2   :  { %12 = vsyncpa [#allocation4], 0  ;;  %s296_s18 = smov [#allocation2]   ;;  %s224_s22 = scalar_lea.hbm %s393_s0, 256 }
   0x3   :  { %s18_s19 = sshll.u32 %s296_s18, 4  ;;  %p225_p0 = scmp.ne.s32.totalorder %s393_s0, %s224_s22  ;;  %s19_s19 = int_to_ptr.vmem [resolvable:$true] %s18_s19 }
   0x4   :  { %p228_p1 = scmp.lt.u32.totalorder %s224_s22, %s393_s0 }
   0x6   :  { %p230_p2 = pnand %p228_p1, %p225_p0 }
   0x8   :  { %233 = shalt.err (!%p230_p2)
}
   0x9   :  { %s234_s27 = scalar_lea.vmem %s19_s19, 256  ;;  %p239_p4 = scmp.lt.s32.totalorder %s19_s19, %s19_s19 }
   0xa   :  { %p235_p3 = scmp.ne.s32.totalorder %s19_s19, %s234_s27  ;;  %p240_p5 = scmp.lt.s32.totalorder %s234_s27, %s234_s27 }
   0xc   :  { %p241_p6 = por %p240_p5, %p239_p4 }
   0xe   :  { %p242_p7 = pnand %p241_p6, %p235_p3 }
  0x10   :  { %245 = shalt.err (!%p242_p7)
}
  0x11   :  { %s297_s28 = smov 128   ;;  %s298_s29 = smov 8  }
  0x12   :  { %24 = dma.hbm_to_vmem [thread:$0]  %s393_s0, 256, %s19_s19, [#allocation3], %s297_s28, %s297_s28, %s298_s29  }
  0x13   :  { %s299_s7 = smov [#allocation5]   ;;  %s246_s11 = scalar_lea.hbm %s396_s3, 256 }
  0x14   :  { %s34_s8 = sshll.u32 %s299_s7, 4  ;;  %p247_p8 = scmp.ne.s32.totalorder %s396_s3, %s246_s11  ;;  %s35_s8 = int_to_ptr.vmem [resolvable:$true] %s34_s8 }
  0x15   :  { %p250_p9 = scmp.lt.u32.totalorder %s246_s11, %s396_s3 }
  0x17   :  { %p252_p10 = pnand %p250_p9, %p247_p8 }
  0x19   :  { %255 = shalt.err (!%p252_p10)
}
  0x1a   :  { %s256_s16 = scalar_lea.vmem %s35_s8, 256  ;;  %p261_p12 = scmp.lt.s32.totalorder %s35_s8, %s35_s8 }
  0x1b   :  { %p257_p11 = scmp.ne.s32.totalorder %s35_s8, %s256_s16  ;;  %p262_p13 = scmp.lt.s32.totalorder %s256_s16, %s256_s16 }
  0x1d   :  { %p263_p0 = por %p262_p13, %p261_p12 }
  0x1f   :  { %p264_p1 = pnand %p263_p0, %p257_p11 }
  0x21   :  { %267 = shalt.err (!%p264_p1)
}
  0x22   :  { %s300_s0 = smov 64   ;;  %s301_s17 = smov 4  }
  0x23   :  { %40 = dma.hbm_to_vmem [thread:$0]  %s396_s3, 256, %s35_s8, [#allocation6], %s300_s0, %s300_s0, %s301_s17  }
  0x24   :  { %290 = dma.done.wait [#allocation3], 256  }
  0x25   :  { %291 = vsyncadd [#allocation3], 4294967040 }
  0x26   :  { %292 = dma.done.wait [#allocation6], 256  }
  0x27   :  { %293 = vsyncadd [#allocation6], 4294967040  ;;  %vm54_vm0 = vcmask 261120   ;;  %v50_v0 = vld [vmem:[#allocation2] sm:$0xff]  ;;  %v51_v1 = vld [vmem:[#allocation2 + $0x8] sm:$0xff]  ;;  %v302_v9 = vmov 0.0  }
  0x28   :  { %v55_v2 = vsel %vm54_vm0, %v50_v0, 0.0  ;;  %v64_v3 = vmul.f32 %v50_v0, %v50_v0  ;;  %v65_v4 = vmul.f32 %v51_v1, %v51_v1  ;;  %v58_v6 = vsel %vm54_vm0, %v51_v1, 0.0  ;;  %v218_v8 = vld [vmem:[#allocation5] sm:$0xff]   ;;  %201 = vmatprep.subr.bf16.mxu0 %v302_v9  ;;  %v219_v10 = vld [vmem:[#allocation5 + $0x8] sm:$0xff]   ;;  %v192_v28 = vld [vmem:[%s394_s1] ss:$0 sm:$0xff] }
  0x29   :  { %56 = vadd.xlane.f32.xlu0 %v55_v2  ;;  %vm303_vm1 = vmmov 0   ;;  %202 = vmatpush3.bf16.msra.mxu0 %v218_v8  ;;  %v193_v33 = vld [vmem:[%s395_s2] ss:$0 sm:$0xff]  ;;  %s304_s1 = smov [#allocation7]  }
  0x2a   :  { %v66_v5 = vsel %vm54_vm0, %v64_v3, 0.0  ;;  %v69_v7 = vsel %vm54_vm0, %v65_v4, 0.0  ;;  %205 = vmatprep.mubr.msk.bf16.mxu0 %vm303_vm1, %v302_v9  ;;  %203 = vmatprep.subr.bf16.mxu0 %v302_v9  ;;  %v194_v38 = vld [vmem:[%s397_s4] ss:$0 sm:$0xff]  ;;  %s179_s25 = sshll.u32 %s304_s1, 4  ;;  %s180_s25 = int_to_ptr.vmem [resolvable:$true] %s179_s25 }
  0x2b   :  { %67 = vadd.xlane.f32.xlu1 %v66_v5  ;;  %s268_s2 = scalar_lea.vmem %s180_s25, 256  ;;  %p273_p3 = scmp.lt.s32.totalorder %s180_s25, %s180_s25 }
  0x2c   :  { %p269_p2 = scmp.ne.s32.totalorder %s180_s25, %s268_s2  ;;  %p274_p4 = scmp.lt.s32.totalorder %s268_s2, %s268_s2 }
  0x2d   :  { %59 = vadd.xlane.f32.xlu0 %v58_v6  ;;  %204 = vmatpush3.bf16.msra.mxu0 %v219_v10 }
  0x2e   :  { %p275_p5 = por %p274_p4, %p273_p3 }
  0x2f   :  { %70 = vadd.xlane.f32.xlu1 %v69_v7 }
  0x30   :  { %p276_p6 = pnand %p275_p5, %p269_p2 }
  0xb6   :  { %v57_v11 = vpop.xlane.xlu0 %56 }
  0xb7   :  { %v62_v12 = vmul.f32 0.03125, %v57_v11 }
  0xb8   :  { %v68_v13 = vpop.xlane.xlu1 %67 }
  0xb9   :  { %v74_v14 = vmul.f32 %v62_v12, %v62_v12  ;;  %v72_v15 = vmul.f32 0.03125, %v68_v13  ;;  %v82_v25 = vsub.f32 %v50_v0, %v62_v12 }
  0xba   :  { %v60_v16 = vpop.xlane.xlu0 %59 }
  0xbb   :  { %v76_v17 = vsub.f32 %v72_v15, %v74_v14  ;;  %v63_v18 = vmul.f32 0.03125, %v60_v16 }
  0xbc   :  { %v71_v19 = vpop.xlane.xlu1 %70 }
  0xbd   :  { %v78_v20 = vadd.f32 1e-05, %v76_v17  ;;  %v75_v21 = vmul.f32 %v63_v18, %v63_v18  ;;  %v73_v22 = vmul.f32 0.03125, %v71_v19  ;;  %v83_v29 = vsub.f32 %v51_v1, %v63_v18 }
  0xbf   :  { %220 = vrsqrt.f32 %v78_v20  ;;  %v77_v23 = vsub.f32 %v73_v22, %v75_v21 }
  0xc1   :  { %v79_v24 = vadd.f32 1e-05, %v77_v23 }
  0xc3   :  { %222 = vrsqrt.f32 %v79_v24 }
  0xc9   :  { %v221_v26 = vpop.eup %220 }
  0xca   :  { %v84_v27 = vmul.f32 %v221_v26, %v82_v25 }
  0xcc   :  { %v92_v32 = vmul.f32 %v192_v28, %v84_v27 }
  0xcd   :  { %v223_v30 = vpop.eup %222 }
  0xce   :  { %v85_v31 = vmul.f32 %v223_v30, %v83_v29  ;;  %v100_v35 = vadd.f32 %v193_v33, %v92_v32 }
  0xd0   :  { %v93_v34 = vmul.f32 %v192_v28, %v85_v31 }
  0xd2   :  { %v101_v36 = vadd.f32 %v193_v33, %v93_v34 }
  0xd4   :  { %v102_v37 = vpack.c.bf16 %v101_v36, %v100_v35 }
  0xd6   :  { %206 = vmatmul.mubr.msk.bf16.vlgmr.msra.gmra.mrb[0].mxu0 %vm54_vm0, %v102_v37 }
 0x1a9   :  { %v163_v39 = vpop.f32.mrb[0].mxu0 }
 0x1aa   :  { %v164_v40 = vadd.f32 %v194_v38, %v163_v39  ;;  %v207_v41 = vpop.f32.mrb[1].mxu0 }
 0x1ab   :  { %v166_v42 = vpop.f32.mrb[2].mxu0 }
 0x1ac   :  { %v170_v43 = vadd.f32 %v164_v40, %v50_v0  ;;  %v167_v44 = vadd.f32 %v194_v38, %v166_v42  ;;  %v208_v45 = vpop.f32.mrb[3].mxu0 }
 0x1ae   :  { %172 = vst.msk [vmem:[#allocation7] sm:$0xff] %vm54_vm0, %v170_v43  ;;  %v171_v46 = vadd.f32 %v167_v44, %v51_v1 }
 0x1b0   :  { %173 = vst.msk [vmem:[#allocation7 + $0x8] sm:$0xff] %vm54_vm0, %v171_v46 }
 0x1b1   :  { %279 = shalt.err (!%p276_p6)
}
 0x1b2   :  { %s280_s27 = scalar_lea.hbm %s398_s5, 256 }
 0x1b3   :  { %p281_p7 = scmp.ne.s32.totalorder %s398_s5, %s280_s27  ;;  %p284_p8 = scmp.lt.u32.totalorder %s280_s27, %s398_s5 }
 0x1b5   :  { %p286_p9 = pnand %p284_p8, %p281_p7 }
 0x1b7   :  { %289 = shalt.err (!%p286_p9)
}
 0x1b8   :  { %185 = dma.vmem_to_hbm [thread:$0]  %s180_s25, 256, %s398_s5, [#allocation4], %s297_s28, %s297_s28, %s298_s29  }
 0x1b9   :  { %294 = dma.done.wait [#allocation4], 256  }
 0x1ba   :  { %295 = vsyncadd [#allocation4], 4294967040 }
 0x1bb   :  { %189 = vsyncpa [#allocation3], 1 }
 0x1bc   :  { %190 = vsyncpa [#allocation6], 1 }
 0x1bd   :  { %191 = vsyncpa [#allocation4], 1 }

</bundles_post_ra>
